<compile_context>
chip_gen: v5e
topology: v5e:2x2
jax: 0.10.0
libtpu: 0.0.40
codegen_flags: <defaults>
</compile_context>

<pallas_src>
import jax
import jax.numpy as jnp
from jax.experimental import pallas as pl
from jax.experimental.pallas import tpu as pltpu


def grad_descent_kernel(w_ref, m_ref, x_ref, o_ref):
    # w_ref: (K, 1)    raw (un-normalized) weights
    # m_ref: (K, TD)   matrices tile (K x D, tiled along D)
    # x_ref: (TB, TD)  input tile
    # o_ref: (TB, TD)  output tile
    w = w_ref[...].astype(jnp.float32)                     # (K, 1)
    w = w - jnp.max(w, axis=0, keepdims=True)              # softmax over K
    e = jnp.exp(w)
    p = e * pl.reciprocal(jnp.sum(e, axis=0, keepdims=True), approx=False)

    m = m_ref[...].astype(jnp.float32)                     # (K, TD)
    summed = jnp.sum(m * p, axis=0, keepdims=True)         # (1, TD)

    out = x_ref[...].astype(jnp.float32) * summed          # broadcast over batch
    o_ref[...] = out.astype(o_ref.dtype)


def _round_up(n, m):
    return ((n + m - 1) // m) * m


def grad_descent_forward(weights, matrices_kd, x, *, tile_b=256, tile_d=512):
    """weights: (K,), matrices_kd: (K, D), x: (B, D) -> (B, D)."""
    K, D = matrices_kd.shape
    B, Dx = x.shape
    assert D == Dx, "feature dims must match"

    # Effective tile sizes: multiples of (8, 128), clamped to (padded) array dims.
    tile_d = max(128, (tile_d // 128) * 128)
    tile_b = max(8, (tile_b // 8) * 8)
    tile_d_eff = min(tile_d, _round_up(D, 128))
    tile_b_eff = min(tile_b, _round_up(B, 8))
    d_pad = _round_up(D, tile_d_eff)
    b_pad = _round_up(B, tile_b_eff)

    # Zero-pad ragged dims (result region is sliced back off afterwards).
    x_p = x
    if b_pad != B or d_pad != D:
        x_p = jnp.pad(x, ((0, b_pad - B), (0, d_pad - D)))
    m_p = matrices_kd
    if d_pad != D:
        m_p = jnp.pad(matrices_kd, ((0, 0), (0, d_pad - D)))
    w2d = weights.reshape(K, 1)

    grid = (d_pad // tile_d_eff, b_pad // tile_b_eff)  # D tiles outer, B tiles inner

    x_bytes = jnp.dtype(x_p.dtype).itemsize
    m_bytes = jnp.dtype(m_p.dtype).itemsize
    o_bytes = x_bytes
    # Double-buffered tiles: x + out + matrices + weights.
    vmem_needed = 2 * (tile_b_eff * tile_d_eff * (x_bytes + o_bytes)
                       + K * tile_d_eff * m_bytes + K * 4)
    vmem_limit = int(min(max(2 * vmem_needed + (2 << 20), 32 << 20), 64 << 20))

    cost = pl.CostEstimate(
        flops=2 * b_pad * d_pad + 2 * K * d_pad,
        transcendentals=K * grid[0] * grid[1],
        bytes_accessed=2 * b_pad * d_pad * x_bytes + K * d_pad * m_bytes + K * 4,
    )

    out = pl.pallas_call(
        grad_descent_kernel,
        out_shape=jax.ShapeDtypeStruct((b_pad, d_pad), x.dtype),
        grid_spec=pltpu.PrefetchScalarGridSpec(
            num_scalar_prefetch=0,
            grid=grid,
            in_specs=[
                pl.BlockSpec((K, 1), lambda i, j: (0, 0)),                  # weights
                pl.BlockSpec((K, tile_d_eff), lambda i, j: (0, i)),         # matrices
                pl.BlockSpec((tile_b_eff, tile_d_eff), lambda i, j: (j, i)),  # x
            ],
            out_specs=pl.BlockSpec((tile_b_eff, tile_d_eff), lambda i, j: (j, i)),
        ),
        compiler_params=pltpu.CompilerParams(
            dimension_semantics=("parallel", "parallel"),
            vmem_limit_bytes=vmem_limit,
        ),
        cost_estimate=cost,
    )(w2d, m_p, x_p)

    if b_pad != B or d_pad != D:
        out = out[:B, :D]
    return out


if __name__ == "__main__":
    key = jax.random.PRNGKey(0)
    k_m, k_x = jax.random.split(key)

    K = 4     # number of matrices (mixture components)
    D = 384   # length of each "matrix" / feature dim
    B = 20    # batch rows of x (non-multiple of 8 -> exercises padding path)

    # torch stores matrices as (D, K); kernel uses (K, D).
    matrices_dk = jax.random.normal(k_m, (D, K), dtype=jnp.float32)
    matrices_kd = matrices_dk.T

    # nn.Parameter init: ones(K) / K
    weights = jnp.ones((K,), dtype=jnp.float32) / K

    x = jax.random.normal(k_x, (B, D), dtype=jnp.float32)

    # Default (large) tiles.
    out = jax.block_until_ready(grad_descent_forward(weights, matrices_kd, x))
    # Small tiles to exercise the multi-step 2-D grid path as well.
    out_small = jax.block_until_ready(
        grad_descent_forward(weights, matrices_kd, x, tile_b=8, tile_d=128))

    # Pure-JAX reference (mirrors the torch forward exactly).
    p = jax.nn.softmax(weights, axis=0)                 # (K,)
    summed = jnp.sum(matrices_dk * p[None, :], axis=1)  # (D,)
    ref = summed[None, :] * x                           # (B, D)

    assert jnp.allclose(out, ref, atol=1e-5, rtol=1e-5)
    assert jnp.allclose(out_small, ref, atol=1e-5, rtol=1e-5)

    print("KERNEL_OK")
</pallas_src>

<mosaic_0001>
module attributes {stable_mosaic.version = 11 : i64} {
  func.func @grad_descent_kernel(%arg0: i32, %arg1: i32, %arg2: memref<4x1xf32, #tpu.memory_space<vmem>>, %arg3: memref<4x384xf32, #tpu.memory_space<vmem>>, %arg4: memref<24x384xf32, #tpu.memory_space<vmem>>, %arg5: memref<24x384xf32, #tpu.memory_space<vmem>>) attributes {dimension_semantics = [#tpu.dimension_semantics<parallel>, #tpu.dimension_semantics<parallel>], iteration_bounds = array<i64: 1, 1>, scalar_prefetch = 0 : i64, scratch_operands = 0 : i64, tpu.core_type = #tpu.core_type<tc>, window_params = [{pipeline_mode = #tpu.pipeline_mode<synchronous>, transform_indices = @transform_0, window_bounds = array<i64: 4, 1>}, {transform_indices = @transform_1, window_bounds = array<i64: 4, 384>}, {transform_indices = @transform_2, window_bounds = array<i64: 24, 384>}, {transform_indices = @transform_3, window_bounds = array<i64: 24, 384>}]} {
    %c0 = arith.constant 0 : index
    %c0_0 = arith.constant 0 : index
    %0 = vector.load %arg2[%c0, %c0_0] : memref<4x1xf32, #tpu.memory_space<vmem>>, vector<4x1xf32>
    %cst = arith.constant dense<0xFF800000> : vector<1xf32>
    %1 = vector.multi_reduction <maximumf>, %0, %cst [0] : vector<4x1xf32> to vector<1xf32>
    %2 = vector.shape_cast %1 : vector<1xf32> to vector<1x1xf32>
    %3 = vector.broadcast %2 : vector<1x1xf32> to vector<4x1xf32>
    %4 = arith.subf %0, %3 : vector<4x1xf32>
    %5 = math.exp %4 : vector<4x1xf32>
    %cst_1 = arith.constant dense<0.000000e+00> : vector<1xf32>
    %6 = vector.multi_reduction <add>, %5, %cst_1 [0] : vector<4x1xf32> to vector<1xf32>
    %7 = vector.shape_cast %6 : vector<1xf32> to vector<1x1xf32>
    %8 = tpu.reciprocal %7 : vector<1x1xf32> -> vector<1x1xf32>
    %9 = vector.broadcast %8 : vector<1x1xf32> to vector<4x1xf32>
    %10 = arith.mulf %5, %9 : vector<4x1xf32>
    %c0_2 = arith.constant 0 : index
    %c0_3 = arith.constant 0 : index
    %11 = vector.load %arg3[%c0_2, %c0_3] : memref<4x384xf32, #tpu.memory_space<vmem>>, vector<4x384xf32>
    %12 = vector.broadcast %10 : vector<4x1xf32> to vector<4x384xf32>
    %13 = arith.mulf %11, %12 : vector<4x384xf32>
    %cst_4 = arith.constant dense<0.000000e+00> : vector<384xf32>
    %14 = vector.multi_reduction <add>, %13, %cst_4 [0] : vector<4x384xf32> to vector<384xf32>
    %15 = vector.shape_cast %14 : vector<384xf32> to vector<1x384xf32>
    %c0_5 = arith.constant 0 : index
    %c0_6 = arith.constant 0 : index
    %16 = vector.load %arg4[%c0_5, %c0_6] : memref<24x384xf32, #tpu.memory_space<vmem>>, vector<24x384xf32>
    %17 = vector.broadcast %15 : vector<1x384xf32> to vector<24x384xf32>
    %18 = arith.mulf %16, %17 : vector<24x384xf32>
    %c0_7 = arith.constant 0 : index
    %c0_8 = arith.constant 0 : index
    %19 = vector.load %arg5[%c0_7, %c0_8] : memref<24x384xf32, #tpu.memory_space<vmem>>, vector<24x384xf32>
    tpu.vector_store %arg5[%c0_7, %c0_8], %18 {strides = array<i32>} : memref<24x384xf32, #tpu.memory_space<vmem>>, vector<24x384xf32>,
    return
  }
  func.func @transform_0(%arg0: i32, %arg1: i32) -> (i32, i32) {
    %c0_i32 = arith.constant 0 : i32
    %c0_i32_0 = arith.constant 0 : i32
    %c0_i32_1 = arith.constant 0 : i32
    return %c0_i32, %c0_i32_0 : i32, i32
  }
  func.func @transform_1(%arg0: i32, %arg1: i32) -> (i32, i32) {
    %c0_i32 = arith.constant 0 : i32
    %c0_i32_0 = arith.constant 0 : i32
    return %c0_i32, %arg0 : i32, i32
  }
  func.func @transform_2(%arg0: i32, %arg1: i32) -> (i32, i32) {
    %c0_i32 = arith.constant 0 : i32
    return %arg1, %arg0 : i32, i32
  }
  func.func @transform_3(%arg0: i32, %arg1: i32) -> (i32, i32) {
    %c0_i32 = arith.constant 0 : i32
    return %arg1, %arg0 : i32, i32
  }
}

</mosaic_0001>

<bundles_post_ra>
// kernel: tpu_custom_call.1
= control target key start
LH: loop header
LB: loop body
LE: loop exit
PB: predicated region body
PF: predicated region fallthrough
CT: control target
= control target key end

     0   :  { %8 = vsyncpa [#allocation3], 0  ;;  %s307_s0 = inlined_call_operand.vmem [shape: f32[4,1], index: 0, kind: input, shape index: {}]   ;;  %s308_s1 = inlined_call_operand.hbm [shape: f32[4,384], index: 1, kind: input, shape index: {}]   ;;  %s309_s2 = inlined_call_operand.hbm [shape: f32[24,384], index: 2, kind: input, shape index: {}]   ;;  %s310_s3 = inlined_call_operand.hbm [shape: f32[24,384], index: 3, kind: output, shape index: {}]  }
   0x1   :  { %9 = vsyncpa [#allocation6], 0 }
   0x2   :  { %10 = vsyncpa [#allocation4], 0  ;;  %s18_s14 = sshll.u32 %s308_s1, 4  ;;  %s262_s15 = smov [#allocation2]   ;;  %s19_s14 = int_to_ptr.hbm [resolvable:$true] %s18_s14 }
   0x3   :  { %s20_s16 = sshll.u32 %s262_s15, 4  ;;  %s28_s19 = sshll.u32 %s309_s2, 4  ;;  %s21_s16 = int_to_ptr.vmem [resolvable:$true] %s20_s16  ;;  %s29_s19 = int_to_ptr.hbm [resolvable:$true] %s28_s19 }
   0x4   :  { %23 = dma.hbm_to_vmem [thread:$0]  %s19_s14, 192, %s21_s16, [#allocation3]  }
   0x5   :  { %s263_s20 = smov [#allocation5]   ;;  %s264_s22 = smov 384  }
   0x6   :  { %s30_s21 = sshll.u32 %s263_s20, 4  ;;  %s265_s23 = smov 24   ;;  %s31_s21 = int_to_ptr.vmem [resolvable:$true] %s30_s21 }
   0x7   :  { %36 = dma.hbm_to_vmem [thread:$0]  %s29_s19, 1152, %s31_s21, [#allocation6], %s264_s22, %s264_s22, %s265_s23  }
   0x8   :  { %256 = dma.done.wait [#allocation3], 192  }
   0x9   :  { %257 = vsyncadd [#allocation3], 4294967104 }
   0xa   :  { %258 = dma.done.wait [#allocation6], 1152  }
   0xb   :  { %259 = vsyncadd [#allocation6], 4294966144  ;;  %v266_v0 = vmov 0   ;;  %vm46_vm0 = vcmask 3072   ;;  %v45_v1 = vld [vmem:[%s307_s0] sm:$0xf] }
   0xc   :  { %179 = vset.pattern.permute.xlu0 %v266_v0  ;;  %v47_v2 = vsel %vm46_vm0, %v45_v1, -inf  ;;  %v267_v30 = vmov 839922192   ;;  %v79_v33 = vld [vmem:[#allocation2] sm:$0xff]  ;;  %v80_v34 = vld [vmem:[#allocation2 + $0x8] sm:$0xf] }
   0xd   :  { %v48_v3 = vrot.slane %v47_v2, 4  ;;  %v86_v31 = vunpack.c.l.s4 %v267_v30  ;;  %vm103_vm5 = vcmask 1043456   ;;  %v125_v60 = vld [vmem:[#allocation5] sm:$0xff]  ;;  %v126_v61 = vld [vmem:[#allocation5 + $0x8] sm:$0xff]  ;;  %v127_v0 = vld [vmem:[#allocation5 + $0x10] sm:$0xff]  ;;  %s268_s0 = smov [#allocation7]  }
   0xe   :  { %s156_s24 = sshll.u32 %s268_s0, 4  ;;  %s158_s27 = sshll.u32 %s310_s3, 4  ;;  %s157_s24 = int_to_ptr.vmem [resolvable:$true] %s156_s24  ;;  %s159_s27 = int_to_ptr.hbm [resolvable:$true] %s158_s27 }
   0xf   :  { %v49_v4 = vmax.f32 %v47_v2, %v48_v3  ;;  %v87_v32 = vunpack.c.0.s8 %v86_v31  ;;  %v129_v3 = vld [vmem:[#allocation5 + $0x20] sm:$0xff] }
  0x11   :  { %v50_v5 = vrot.slane %v49_v4, 2 }
  0x13   :  { %v51_v6 = vmax.f32 %v49_v4, %v50_v5  ;;  %v130_v4 = vld [vmem:[#allocation5 + $0x28] sm:$0xff] }
  0x15   :  { %v52_v7 = vrot.slane %v51_v6, 1 }
  0x17   :  { %v53_v8 = vmax.f32 %v51_v6, %v52_v7  ;;  %v131_v7 = vld [vmem:[#allocation5 + $0x30] sm:$0xff] }
  0x19   :  { %v54_v9 = vsub.f32 %v45_v1, %v53_v8  ;;  %v128_v1 = vld [vmem:[#allocation5 + $0x18] sm:$0xff] }
  0x1b   :  { %v55_v10 = vmul.f32 1.442695, %v54_v9 }
  0x1d   :  { %180 = vpow2.f32 %v55_v10  ;;  %v132_v10 = vld [vmem:[#allocation5 + $0x38] sm:$0xff] }
  0x23   :  { %v181_v11 = vpop.eup %180 }
  0x24   :  { %v57_v12 = vsel %vm46_vm0, %v181_v11, 0.0 }
  0x25   :  { %v58_v13 = vrot.slane %v57_v12, 4 }
  0x27   :  { %v59_v14 = vadd.f32 %v58_v13, %v57_v12  ;;  %v133_v12 = vld [vmem:[#allocation5 + $0x40] sm:$0xff] }
  0x29   :  { %v60_v15 = vrot.slane %v59_v14, 2 }
  0x2b   :  { %v61_v16 = vadd.f32 %v60_v15, %v59_v14 }
  0x2d   :  { %v62_v17 = vrot.slane %v61_v16, 1 }
  0x2f   :  { %v63_v18 = vadd.f32 %v62_v17, %v61_v16 }
  0x31   :  { %182 = vrcp.f32 %v63_v18  ;;  %v75_v21 = vand.u32 2147483648, %v63_v18  ;;  %vm69_vm1 = vweird.f32 %v63_v18  ;;  %v73_v23 = vand.u32 2147483647, %v63_v18 }
  0x33   :  { %v76_v25 = vor.u32 1.1754944e-38, %v75_v21  ;;  %vm74_vm4 = vcmp.eq.f32.partialorder %v73_v23, 8.507059e+37 }
  0x37   :  { %v183_v19 = vpop.eup %182 }
  0x38   :  { %v65_v20 = vmul.f32 %v183_v19, %v63_v18  ;;  %vm70_vm2 = vweird.f32 %v183_v19 }
  0x39   :  { %vm71_vm3 = vmor %vm69_vm1, %vm70_vm2 }
  0x3a   :  { %v66_v22 = vsub.f32 1.0, %v65_v20 }
  0x3c   :  { %v67_v24 = vmul.f32 %v183_v19, %v66_v22 }
  0x3e   :  { %v68_v26 = vadd.f32 %v183_v19, %v67_v24 }
  0x40   :  { %v72_v27 = vsel %vm71_vm3, %v183_v19, %v68_v26 }
  0x41   :  { %v77_v28 = vsel %vm74_vm4, %v76_v25, %v72_v27 }
  0x42   :  { %v78_v29 = vmul.f32 %v181_v11, %v77_v28 }
  0x44   :  { %83 = vperm.xlu0 %179, %v78_v29  }
  0xb6   :  { %v84_v35 = vpop.permute.xlu0 %83 }
  0xb7   :  { %v88_v36 = vperm.slane %v84_v35, %v87_v32 }
  0xb9   :  { %v90_v37 = vmul.f32 %v88_v36, %v79_v33  ;;  %v91_v38 = vmul.f32 %v88_v36, %v80_v34 }
  0xbb   :  { %94 = vst [vmem:[#allocation1] ss:$2 sm:$0xff] %v90_v37 }
  0xbc   :  { %96 = vst [vmem:[#allocation1 + $0x10] ss:$2 sm:$0xff] %v91_v38 }
  0xc2   :  { %v97_v39 = vld.sshfl [vmem:[#allocation1] sm:$0xff pattern:$0x75316420]  ;;  %v98_v40 = vld.sshfl [vmem:[#allocation1 + $0x8] sm:$0xff pattern:$0x75316420] }
  0xc3   :  { %v99_v41 = vld.sshfl [vmem:[#allocation1 + $0x10] sm:$0xff pattern:$0x75316420]  ;;  %v104_v42 = vsel %vm103_vm5, %v97_v39, 0.0  ;;  %v111_v43 = vsel %vm103_vm5, %v98_v40, 0.0 }
  0xc4   :  { %v105_v44 = vrot.slane %v104_v42, 4  ;;  %v112_v45 = vrot.slane %v111_v43, 4  ;;  %v118_v46 = vsel %vm103_vm5, %v99_v41, 0.0 }
  0xc5   :  { %v119_v47 = vrot.slane %v118_v46, 4 }
  0xc6   :  { %v106_v48 = vadd.f32 %v105_v44, %v104_v42  ;;  %v113_v49 = vadd.f32 %v112_v45, %v111_v43 }
  0xc7   :  { %v120_v50 = vadd.f32 %v119_v47, %v118_v46 }
  0xc8   :  { %v107_v51 = vrot.slane %v106_v48, 2  ;;  %v114_v52 = vrot.slane %v113_v49, 2 }
  0xc9   :  { %v121_v53 = vrot.slane %v120_v50, 2 }
  0xca   :  { %v108_v54 = vadd.f32 %v107_v51, %v106_v48  ;;  %v115_v55 = vadd.f32 %v114_v52, %v113_v49 }
  0xcb   :  { %v122_v56 = vadd.f32 %v121_v53, %v120_v50 }
  0xcc   :  { %v109_v57 = vrot.slane %v108_v54, 1  ;;  %v116_v58 = vrot.slane %v115_v55, 1 }
  0xcd   :  { %v123_v59 = vrot.slane %v122_v56, 1 }
  0xce   :  { %v110_v62 = vadd.f32 %v109_v57, %v108_v54  ;;  %v117_v63 = vadd.f32 %v116_v58, %v115_v55 }
  0xcf   :  { %v124_v2 = vadd.f32 %v123_v59, %v122_v56 }
  0xd0   :  { %v134_v5 = vmul.f32 %v125_v60, %v110_v62  ;;  %v135_v6 = vmul.f32 %v126_v61, %v117_v63  ;;  %v137_v9 = vmul.f32 %v128_v1, %v110_v62  ;;  %v138_v11 = vmul.f32 %v129_v3, %v117_v63 }
  0xd1   :  { %v136_v8 = vmul.f32 %v127_v0, %v124_v2  ;;  %v139_v13 = vmul.f32 %v130_v4, %v124_v2  ;;  %v140_v14 = vmul.f32 %v131_v7, %v110_v62  ;;  %v141_v15 = vmul.f32 %v132_v10, %v117_v63 }
  0xd2   :  { %143 = vst [vmem:[#allocation7] sm:$0xff] %v134_v5  ;;  %v142_v16 = vmul.f32 %v133_v12, %v124_v2 }
  0xd3   :  { %144 = vst [vmem:[#allocation7 + $0x8] sm:$0xff] %v135_v6 }
  0xd4   :  { %145 = vst [vmem:[#allocation7 + $0x10] sm:$0xff] %v136_v8 }
  0xd5   :  { %146 = vst [vmem:[#allocation7 + $0x18] sm:$0xff] %v137_v9 }
  0xd6   :  { %147 = vst [vmem:[#allocation7 + $0x20] sm:$0xff] %v138_v11 }
  0xd7   :  { %148 = vst [vmem:[#allocation7 + $0x28] sm:$0xff] %v139_v13 }
  0xd8   :  { %149 = vst [vmem:[#allocation7 + $0x30] sm:$0xff] %v140_v14 }
  0xd9   :  { %150 = vst [vmem:[#allocation7 + $0x38] sm:$0xff] %v141_v15 }
  0xda   :  { %151 = vst [vmem:[#allocation7 + $0x40] sm:$0xff] %v142_v16 }
  0xdb   :  { %164 = dma.vmem_to_hbm [thread:$0]  %s157_s24, 1152, %s159_s27, [#allocation4], %s264_s22, %s264_s22, %s265_s23  }
  0xdc   :  { %260 = dma.done.wait [#allocation4], 1152  }
  0xdd   :  { %261 = vsyncadd [#allocation4], 4294966144 }
  0xde   :  { %169 = vsyncpa [#allocation3], 1 }
  0xdf   :  { %170 = vsyncpa [#allocation6], 1 }
  0xe0   :  { %171 = vsyncpa [#allocation4], 1 }

</bundles_post_ra>
